<compile_context>
chip_gen: v5e
topology: v5e:2x2
jax: 0.10.0
libtpu: 0.0.40
codegen_flags: <defaults>
</compile_context>

<pallas_src>
import math

import jax
import jax.numpy as jnp
from jax.experimental import pallas as pl
from jax.experimental.pallas import tpu as pltpu


def _round_up(x, m):
    return ((x + m - 1) // m) * m


def _largest_tile(dim, cands=(512, 384, 256, 128)):
    """Largest tile from cands that divides dim (dim is a multiple of 128)."""
    for c in cands:
        if c <= dim and dim % c == 0:
            return c
    return dim


# ----------------------------------------------------------------------------
# Shared tiled matmul + bias:  (N, K) @ (K, M) + b  -> (N, M)
# Weights arrive pre-transposed (K, M) in bf16. Activations are read as-is
# (f32 or bf16) and cast to bf16 in-kernel; accumulation is f32.
# Two variants: K fits one tile (no grid-K, no scratch) and multi-K (acc
# scratch initialized with the bias, so there is no epilogue add).
# ----------------------------------------------------------------------------
def _matmul_bias_kernel_1(x_ref, w_ref, b_ref, o_ref):
    acc = jnp.dot(x_ref[...].astype(jnp.bfloat16),
                  w_ref[...].astype(jnp.bfloat16),
                  preferred_element_type=jnp.float32)
    o_ref[...] = (acc + b_ref[...]).astype(o_ref.dtype)


def _matmul_bias_kernel_k(x_ref, w_ref, b_ref, o_ref, acc_ref):
    @pl.when(pl.program_id(2) == 0)
    def _():
        acc_ref[...] = jnp.broadcast_to(b_ref[...], acc_ref.shape)

    acc_ref[...] += jnp.dot(x_ref[...].astype(jnp.bfloat16),
                            w_ref[...].astype(jnp.bfloat16),
                            preferred_element_type=jnp.float32)

    @pl.when(pl.program_id(2) == pl.num_programs(2) - 1)
    def _():
        o_ref[...] = acc_ref[...].astype(o_ref.dtype)


def matmul_bias(x, w, b, *, out_dtype=jnp.float32, vmem_budget=40 << 20):
    """x: (N, K), w: (K, M) pre-transposed bf16, b: (M,) f32 -> (N, M)."""
    N, K = x.shape
    Kw, M = w.shape
    assert K == Kw and N % 8 == 0 and K % 128 == 0 and M % 128 == 0, (x.shape, w.shape)

    tk = _largest_tile(K)
    tm = _largest_tile(M)
    gk = K // tk
    xb = x.dtype.itemsize
    ob = jnp.dtype(out_dtype).itemsize

    def footprint(tn):
        return (2 * tn * tk * xb + 2 * tk * tm * 2 + 2 * tm * 4
                + 2 * tn * tm * ob + (tn * tm * 4 if gk > 1 else 0))

    # Row tile: cover all N when it fits VMEM so the (possibly huge) weight
    # streams from HBM exactly once; otherwise shrink (largest tile that fits).
    if footprint(N) <= vmem_budget:
        tn = N
    else:
        tn = 128
        for cand in (4096, 2048, 1024, 512, 256):
            if cand < N and footprint(cand) <= vmem_budget:
                tn = cand
                break
    Np = _round_up(N, tn)
    x_p = jnp.pad(x, ((0, Np - N), (0, 0))) if Np != N else x
    b2 = b.astype(jnp.float32).reshape(1, M)

    gn, gm = Np // tn, M // tm
    flops = 2 * Np * M * K
    bytes_accessed = Np * K * xb + K * M * 2 + M * 4 + Np * M * ob
    ce = pl.CostEstimate(flops=int(flops), transcendentals=0,
                         bytes_accessed=int(bytes_accessed))

    if gk == 1:
        out = pl.pallas_call(
            _matmul_bias_kernel_1,
            out_shape=jax.ShapeDtypeStruct((Np, M), out_dtype),
            grid_spec=pltpu.PrefetchScalarGridSpec(
                num_scalar_prefetch=0,
                grid=(gn, gm),
                in_specs=[
                    pl.BlockSpec((tn, tk), lambda i, j: (i, 0)),   # x tile
                    pl.BlockSpec((tk, tm), lambda i, j: (0, j)),   # w tile
                    pl.BlockSpec((1, tm), lambda i, j: (0, j)),    # bias tile
                ],
                out_specs=pl.BlockSpec((tn, tm), lambda i, j: (i, j)),
            ),
            compiler_params=pltpu.CompilerParams(
                dimension_semantics=("parallel", "parallel"),
                vmem_limit_bytes=48 << 20),
            cost_estimate=ce,
        )(x_p, w, b2)
    else:
        out = pl.pallas_call(
            _matmul_bias_kernel_k,
            out_shape=jax.ShapeDtypeStruct((Np, M), out_dtype),
            grid_spec=pltpu.PrefetchScalarGridSpec(
                num_scalar_prefetch=0,
                grid=(gn, gm, gk),
                in_specs=[
                    pl.BlockSpec((tn, tk), lambda i, j, k: (i, k)),
                    pl.BlockSpec((tk, tm), lambda i, j, k: (k, j)),
                    pl.BlockSpec((1, tm), lambda i, j, k: (0, j)),
                ],
                out_specs=pl.BlockSpec((tn, tm), lambda i, j, k: (i, j)),
                scratch_shapes=[pltpu.VMEM((tn, tm), jnp.float32)],
            ),
            compiler_params=pltpu.CompilerParams(
                dimension_semantics=("parallel", "parallel", "arbitrary"),
                vmem_limit_bytes=48 << 20),
            cost_estimate=ce,
        )(x_p, w, b2)

    return out[:N] if Np != N else out


# ----------------------------------------------------------------------------
# LSTM recurrence, streamed over T-chunks.
# gx = x @ W_ih^T + (b_ih + b_hh) is precomputed; per step only the h @ W_hh
# matmul plus gate math runs. Gate order follows PyTorch: i, f, g, o.
# h/c persist in VMEM scratch across grid iterations; gx/y chunks are
# double-buffered DMA behind the serial recurrence.
# ----------------------------------------------------------------------------
def _lstm_recurrence_kernel(gx_ref, h0_ref, c0_ref, whh_ref,
                            y_ref, hn_ref, cn_ref, h_sc, c_sc):
    @pl.when(pl.program_id(0) == 0)
    def _():
        h_sc[...] = h0_ref[...]
        c_sc[...] = c0_ref[...]

    Tc = gx_ref.shape[0]
    Hp = h_sc.shape[1]
    w_hh = whh_ref[...]                                      # (Hp, 4Hp) bf16

    def step(t, carry):
        h, c = carry
        gates = gx_ref[t] + jnp.dot(h.astype(jnp.bfloat16), w_hh,
                                    preferred_element_type=jnp.float32)
        i_g = jax.nn.sigmoid(gates[:, 0 * Hp:1 * Hp])
        f_g = jax.nn.sigmoid(gates[:, 1 * Hp:2 * Hp])
        g_g = jnp.tanh(gates[:, 2 * Hp:3 * Hp])
        o_g = jax.nn.sigmoid(gates[:, 3 * Hp:4 * Hp])
        c_new = f_g * c + i_g * g_g
        h_new = o_g * jnp.tanh(c_new)
        y_ref[t] = h_new.astype(y_ref.dtype)
        return h_new, c_new

    h_n, c_n = jax.lax.fori_loop(0, Tc, step, (h_sc[...], c_sc[...]),
                                 unroll=True)
    h_sc[...] = h_n
    c_sc[...] = c_n

    @pl.when(pl.program_id(0) == pl.num_programs(0) - 1)
    def _():
        hn_ref[...] = h_n
        cn_ref[...] = c_n


def lstm_recurrence(gx, h0, c0, w_hh_t, *, chunk=8, vmem_budget=44 << 20):
    """gx: (T, Bp, 4Hp) f32; h0/c0: (Bp, Hp) f32; w_hh_t: (Hp, 4Hp) bf16."""
    T, Bp, H4 = gx.shape
    Hp = H4 // 4

    # Persistent footprint: W_hh buffers + h0/c0/hn/cn buffers + h/c scratch.
    base = 2 * Hp * H4 * 2 + 6 * Bp * Hp * 4
    Tc = 1
    for c in range(min(chunk, T), 0, -1):
        if T % c == 0 and base + 2 * c * Bp * H4 * 4 + 2 * c * Bp * Hp * 2 <= vmem_budget:
            Tc = c
            break
    fp = base + 2 * Tc * Bp * H4 * 4 + 2 * Tc * Bp * Hp * 2
    vmem_limit = int(min(max(fp + (8 << 20), 32 << 20), 56 << 20))

    flops = 2 * T * Bp * Hp * H4
    transcendentals = 5 * T * Bp * Hp
    bytes_accessed = 4 * T * Bp * H4 + 2 * T * Bp * Hp + 2 * Hp * H4 + 16 * Bp * Hp

    return pl.pallas_call(
        _lstm_recurrence_kernel,
        out_shape=(
            jax.ShapeDtypeStruct((T, Bp, Hp), jnp.bfloat16),    # y (bf16 stores)
            jax.ShapeDtypeStruct((Bp, Hp), jnp.float32),        # h_n
            jax.ShapeDtypeStruct((Bp, Hp), jnp.float32),        # c_n
        ),
        grid_spec=pltpu.PrefetchScalarGridSpec(
            num_scalar_prefetch=0,
            grid=(T // Tc,),
            in_specs=[
                pl.BlockSpec((Tc, Bp, H4), lambda t: (t, 0, 0)),   # gx chunk
                pl.BlockSpec((Bp, Hp), lambda t: (0, 0)),          # h0
                pl.BlockSpec((Bp, Hp), lambda t: (0, 0)),          # c0
                pl.BlockSpec((Hp, H4), lambda t: (0, 0)),          # W_hh (resident)
            ],
            out_specs=[
                pl.BlockSpec((Tc, Bp, Hp), lambda t: (t, 0, 0)),   # y chunk
                pl.BlockSpec((Bp, Hp), lambda t: (0, 0)),          # h_n
                pl.BlockSpec((Bp, Hp), lambda t: (0, 0)),          # c_n
            ],
            scratch_shapes=[pltpu.VMEM((Bp, Hp), jnp.float32),     # h carry
                            pltpu.VMEM((Bp, Hp), jnp.float32)],    # c carry
        ),
        compiler_params=pltpu.CompilerParams(
            dimension_semantics=("arbitrary",),
            vmem_limit_bytes=vmem_limit),
        cost_estimate=pl.CostEstimate(flops=int(flops),
                                      transcendentals=int(transcendentals),
                                      bytes_accessed=int(bytes_accessed)),
    )(gx, h0, c0, w_hh_t)


# ----------------------------------------------------------------------------
# Parameter init (PyTorch layout) and one-time preparation (pad + transpose +
# bf16 cast). Padding is per-gate so gate slices stay lane-aligned; padded
# weight rows/cols are zero, which keeps real outputs exact.
# ----------------------------------------------------------------------------
def init_params(key, ntoken, ninp, nhid, nlayers):
    keys = jax.random.split(key, 2 + 4 * nlayers)
    initrange = 0.1
    params = {
        "encoder_w": jax.random.uniform(keys[0], (ntoken, ninp),
                                        minval=-initrange, maxval=initrange,
                                        dtype=jnp.float32),
        "decoder_w": jax.random.uniform(keys[1], (ntoken, nhid),
                                        minval=-initrange, maxval=initrange,
                                        dtype=jnp.float32),
        "decoder_b": jnp.zeros((ntoken,), jnp.float32),
        "lstm": [],
    }
    stdv = 1.0 / math.sqrt(nhid)
    for l in range(nlayers):
        in_dim = ninp if l == 0 else nhid
        k = keys[2 + 4 * l: 2 + 4 * (l + 1)]
        params["lstm"].append({
            "w_ih": jax.random.uniform(k[0], (4 * nhid, in_dim),
                                       minval=-stdv, maxval=stdv, dtype=jnp.float32),
            "w_hh": jax.random.uniform(k[1], (4 * nhid, nhid),
                                       minval=-stdv, maxval=stdv, dtype=jnp.float32),
            "b_ih": jax.random.uniform(k[2], (4 * nhid,),
                                       minval=-stdv, maxval=stdv, dtype=jnp.float32),
            "b_hh": jax.random.uniform(k[3], (4 * nhid,),
                                       minval=-stdv, maxval=stdv, dtype=jnp.float32),
        })
    return params


def prepare_params(params, ntoken, ninp, nhid):
    Ip = _round_up(ninp, 128)
    Hp = _round_up(nhid, 128)
    Vp = _round_up(ntoken, 128)

    enc = jnp.pad(params["encoder_w"], ((0, 0), (0, Ip - ninp)))
    enc_p = enc.astype(jnp.bfloat16)                             # bf16 gather table

    lstm_prepared = []
    for l, lp in enumerate(params["lstm"]):
        in_dim = ninp if l == 0 else nhid
        in_p = Ip if l == 0 else Hp
        w_ih = lp["w_ih"].reshape(4, nhid, in_dim)
        w_ih = jnp.pad(w_ih, ((0, 0), (0, Hp - nhid), (0, in_p - in_dim)))
        w_ih_t = w_ih.reshape(4 * Hp, in_p).T                    # (in_p, 4Hp)
        w_hh = lp["w_hh"].reshape(4, nhid, nhid)
        w_hh = jnp.pad(w_hh, ((0, 0), (0, Hp - nhid), (0, Hp - nhid)))
        w_hh_t = w_hh.reshape(4 * Hp, Hp).T                      # (Hp, 4Hp)
        b = (lp["b_ih"] + lp["b_hh"]).reshape(4, nhid)
        b = jnp.pad(b, ((0, 0), (0, Hp - nhid))).reshape(4 * Hp)
        lstm_prepared.append({
            "w_ih_t": w_ih_t.astype(jnp.bfloat16),
            "w_hh_t": w_hh_t.astype(jnp.bfloat16),
            "b": b.astype(jnp.float32),
        })

    dec_w = jnp.pad(params["decoder_w"], ((0, Vp - ntoken), (0, Hp - nhid)))
    dec_b = jnp.pad(params["decoder_b"], (0, Vp - ntoken))
    return {
        "ntoken": ntoken, "ninp": ninp, "nhid": nhid,
        "ntoken_p": Vp, "ninp_p": Ip, "nhid_p": Hp,
        "encoder_w": enc_p,
        "decoder_w_t": dec_w.T.astype(jnp.bfloat16),             # (Hp, Vp)
        "decoder_b": dec_b.astype(jnp.float32),
        "lstm": lstm_prepared,
    }


# ----------------------------------------------------------------------------
# Full RNNModel forward
# ----------------------------------------------------------------------------
def rnn_model_forward(prepared, tokens, hidden):
    """tokens: (T, B) int32; hidden: (h0, c0) each (nlayers, B, nhid)."""
    h0_all, c0_all = hidden
    T, B = tokens.shape
    nhid, Hp = prepared["nhid"], prepared["nhid_p"]
    V, Vp = prepared["ntoken"], prepared["ntoken_p"]
    Bp = _round_up(B, 8)

    # Embedding gather directly into the batch-padded layout (plain JAX gather);
    # dropout = identity (eval). Padded batch rows never contaminate real rows.
    tokens_p = jnp.pad(tokens, ((0, 0), (0, Bp - B))) if Bp != B else tokens
    x = prepared["encoder_w"][tokens_p]                          # (T, Bp, Ip) bf16

    hn_list, cn_list = [], []
    for l, lp in enumerate(prepared["lstm"]):
        h0 = jnp.pad(h0_all[l], ((0, Bp - B), (0, Hp - nhid)))
        c0 = jnp.pad(c0_all[l], ((0, Bp - B), (0, Hp - nhid)))
        in_dim = x.shape[-1]
        # Hoisted input projection over all timesteps (one big MXU matmul).
        gx = matmul_bias(x.reshape(T * Bp, in_dim), lp["w_ih_t"], lp["b"])
        gx = gx.reshape(T, Bp, 4 * Hp)
        y, hn, cn = lstm_recurrence(gx, h0, c0, lp["w_hh_t"])
        hn_list.append(hn[:B, :nhid])
        cn_list.append(cn[:B, :nhid])
        x = y                                                    # inter-layer dropout = identity

    # Output dropout = identity (eval); decoder over all timesteps at once.
    decoded = matmul_bias(x.reshape(T * Bp, Hp), prepared["decoder_w_t"],
                          prepared["decoder_b"])
    decoded = decoded.reshape(T, Bp, Vp)[:, :B, :V]
    hidden_out = (jnp.stack(hn_list, axis=0), jnp.stack(cn_list, axis=0))
    return decoded, hidden_out


def init_hidden(nlayers, bsz, nhid):
    return (jnp.zeros((nlayers, bsz, nhid), jnp.float32),
            jnp.zeros((nlayers, bsz, nhid), jnp.float32))


# ----------------------------------------------------------------------------
# Pure-JAX f32 reference (mirrors torch nn.LSTM math) for validation.
# ----------------------------------------------------------------------------
def _reference_forward(params, tokens, hidden):
    h_all, c_all = hidden
    x = params["encoder_w"][tokens]                              # (T, B, ninp) f32
    hs, cs = [], []
    for l, lp in enumerate(params["lstm"]):
        h, c = h_all[l], c_all[l]
        ys = []
        for t in range(x.shape[0]):
            g = x[t] @ lp["w_ih"].T + lp["b_ih"] + h @ lp["w_hh"].T + lp["b_hh"]
            i_g, f_g, g_g, o_g = jnp.split(g, 4, axis=-1)
            i_g, f_g, o_g = (jax.nn.sigmoid(i_g), jax.nn.sigmoid(f_g),
                             jax.nn.sigmoid(o_g))
            g_g = jnp.tanh(g_g)
            c = f_g * c + i_g * g_g
            h = o_g * jnp.tanh(c)
            ys.append(h)
        x = jnp.stack(ys)
        hs.append(h)
        cs.append(c)
    T, B = tokens.shape
    dec = x.reshape(T * B, -1) @ params["decoder_w"].T + params["decoder_b"]
    return dec.reshape(T, B, -1), (jnp.stack(hs), jnp.stack(cs))


if __name__ == "__main__":
    # Small config faithful to the spec's shapes (hidden=1024, embed~300);
    # vocab/embed/batch intentionally unaligned to exercise the padding paths.
    ntoken = 500
    ninp = 300
    nhid = 1024
    nlayers = 2
    seq_len = 6
    batch = 2

    key = jax.random.PRNGKey(0)
    pkey, tkey = jax.random.split(key)
    params = init_params(pkey, ntoken, ninp, nhid, nlayers)
    prepared = prepare_params(params, ntoken, ninp, nhid)

    tokens = jax.random.randint(tkey, (seq_len, batch), 0, ntoken, dtype=jnp.int32)
    hidden = init_hidden(nlayers, batch, nhid)

    logits, (h_n, c_n) = rnn_model_forward(prepared, tokens, hidden)
    jax.block_until_ready((logits, h_n, c_n))

    assert logits.shape == (seq_len, batch, ntoken)
    assert h_n.shape == (nlayers, batch, nhid)
    assert c_n.shape == (nlayers, batch, nhid)
    assert bool(jnp.all(jnp.isfinite(logits)))

    # Validate against a pure f32 reference (bf16 MXU => loose tolerance).
    ref_logits, (ref_h, ref_c) = _reference_forward(params, tokens, hidden)
    max_err = float(jnp.max(jnp.abs(logits - ref_logits)))
    h_err = float(jnp.max(jnp.abs(h_n - ref_h)))
    assert max_err < 0.15, f"logits mismatch vs f32 reference: {max_err}"
    assert h_err < 0.15, f"hidden mismatch vs f32 reference: {h_err}"

    print("KERNEL_OK")
</pallas_src>

<mosaic_0001>
module attributes {stable_mosaic.version = 11 : i64} {
  func.func @_matmul_bias_kernel_1(%arg0: i32, %arg1: i32, %arg2: memref<48x384xbf16, #tpu.memory_space<vmem>>, %arg3: memref<384x512xbf16, #tpu.memory_space<vmem>>, %arg4: memref<1x512xf32, #tpu.memory_space<vmem>>, %arg5: memref<48x512xf32, #tpu.memory_space<vmem>>) attributes {dimension_semantics = [#tpu.dimension_semantics<parallel>, #tpu.dimension_semantics<parallel>], iteration_bounds = array<i64: 1, 8>, scalar_prefetch = 0 : i64, scratch_operands = 0 : i64, tpu.core_type = #tpu.core_type<tc>, window_params = [{transform_indices = @transform_0, window_bounds = array<i64: 48, 384>}, {transform_indices = @transform_1, window_bounds = array<i64: 384, 512>}, {transform_indices = @transform_2, window_bounds = array<i64: 1, 512>}, {transform_indices = @transform_3, window_bounds = array<i64: 48, 512>}]} {
    %c0 = arith.constant 0 : index
    %c0_0 = arith.constant 0 : index
    %0 = vector.load %arg2[%c0, %c0_0] : memref<48x384xbf16, #tpu.memory_space<vmem>>, vector<48x384xbf16>
    %c0_1 = arith.constant 0 : index
    %c0_2 = arith.constant 0 : index
    %1 = vector.load %arg3[%c0_1, %c0_2] : memref<384x512xbf16, #tpu.memory_space<vmem>>, vector<384x512xbf16>
    %cst = arith.constant dense<0.000000e+00> : vector<48x512xf32>
    %2 = tpu.matmul %0, %1, %cst {dimension_numbers = #tpu.dot_dimension_numbers<[1], [0], [0], [1], [0, 0, 1, 1], [], []>} : vector<48x384xbf16>, vector<384x512xbf16>, vector<48x512xf32> -> vector<48x512xf32>
    %c0_3 = arith.constant 0 : index
    %c0_4 = arith.constant 0 : index
    %3 = vector.load %arg4[%c0_3, %c0_4] : memref<1x512xf32, #tpu.memory_space<vmem>>, vector<1x512xf32>
    %4 = vector.broadcast %3 : vector<1x512xf32> to vector<48x512xf32>
    %5 = arith.addf %2, %4 : vector<48x512xf32>
    %c0_5 = arith.constant 0 : index
    %c0_6 = arith.constant 0 : index
    %6 = vector.load %arg5[%c0_5, %c0_6] : memref<48x512xf32, #tpu.memory_space<vmem>>, vector<48x512xf32>
    tpu.vector_store %arg5[%c0_5, %c0_6], %5 {strides = array<i32>} : memref<48x512xf32, #tpu.memory_space<vmem>>, vector<48x512xf32>,
    return
  }
  func.func @transform_0(%arg0: i32, %arg1: i32) -> (i32, i32) {
    %c0_i32 = arith.constant 0 : i32
    %c0_i32_0 = arith.constant 0 : i32
    return %arg0, %c0_i32 : i32, i32
  }
  func.func @transform_1(%arg0: i32, %arg1: i32) -> (i32, i32) {
    %c0_i32 = arith.constant 0 : i32
    %c0_i32_0 = arith.constant 0 : i32
    return %c0_i32, %arg1 : i32, i32
  }
  func.func @transform_2(%arg0: i32, %arg1: i32) -> (i32, i32) {
    %c0_i32 = arith.constant 0 : i32
    %c0_i32_0 = arith.constant 0 : i32
    return %c0_i32, %arg1 : i32, i32
  }
  func.func @transform_3(%arg0: i32, %arg1: i32) -> (i32, i32) {
    %c0_i32 = arith.constant 0 : i32
    return %arg0, %arg1 : i32, i32
  }
}

</mosaic_0001>

<bundles_post_ra>
// kernel: tpu_custom_call.1
= control target key start
LH: loop header
LB: loop body
LE: loop exit
PB: predicated region body
PF: predicated region fallthrough
CT: control target
= control target key end

     0   :  { %s2667_s0 = inlined_call_operand.hbm [shape: bf16[48,384], index: 0, kind: input, shape index: {}]   ;;  %s2668_s1 = inlined_call_operand.hbm [shape: bf16[384,4096], index: 1, kind: input, shape index: {}]   ;;  %s2669_s2 = inlined_call_operand.hbm [shape: f32[1,4096], index: 2, kind: input, shape index: {}]   ;;  %s2670_s3 = inlined_call_operand.hbm [shape: f32[48,4096], index: 3, kind: output, shape index: {}]  }
   0x1   :  { %2671 = sst [smem:[#allocation12_spill]] %s2667_s0 }
   0x2   :  { %2672 = sst [smem:[#allocation13_spill]] %s2668_s1 }
   0x3   :  { %8 = vsyncpa [#allocation3], 0 }
   0x4   :  { %9 = vsyncpa [#allocation6], 0 }
   0x5   :  { %11 = vsyncpa [#allocation6 + $0x1], 0 }
   0x6   :  { %12 = vsyncpa [#allocation4], 0 }
   0x7   :  { %14 = vsyncpa [#allocation4 + $0x1], 0  ;;  %s2206_s12 = smov 0   ;;  %s2208_s13 = smov 0  }
   0x8   :  { %s2210_s14 = smov 0   ;;  %s2212_s15 = smov 0  }
   0x9   :  { %s2214_s16 = smov 0   ;;  %s2216_s17 = smov 0  }
   0xa LB: > { %s29_s18 = sadd.s32 1, %s2171_s16  ;;  %s65_s19 = sadd.s32 1, %s2163_s14  ;;  %s2175_s17 = sphi %s2216_s17, %s20_s17   ;;  %s2171_s16 = sphi %s2214_s16, %s2684_s16   ;;  %s2167_s15 = sphi %s2212_s15, %s2683_s15   ;;  %s2163_s14 = sphi %s2210_s14, %s2682_s14   ;;  %s2159_s13 = sphi %s2208_s13, %s2681_s13   ;;  %s2155_s12 = sphi %s2206_s12, %s2680_s12  }
   0xb   : > { %p30_p0 = scmp.ge.s32.totalorder %s29_s18, 8  ;;  %p72_p1 = scmp.ne.s32.totalorder %s2163_s14, %s2159_s13 }
   0xc   : > { %p73_p2 = scmp.eq.s32.totalorder %s2175_s17, 0  ;;  %p1939_p4 = scmp.lt.s32.totalorder %s2175_s17, 8 }
   0xd   : > { %s2686_s18 = smov (%p30_p0, %s29_s18), 0  ;;  %s174_s21 = sand.u32 1, %s2175_s17  }
   0xe   : > { %p74_p3 = por %p73_p2, %p72_p1  ;;  %s62_s20 = ssub.s32 %s2171_s16, %s2686_s18 }
   0xf   : > { %p63_p5 = scmp.eq.s32.totalorder %s62_s20, 0  ;;  %s176_s22 = sand.u32 1, %s2163_s14  }
  0x10   : > { %s1803_s23 = sshll.u32 %s2171_s16, 4  ;;  %s1910_s25 = smul.u32 768, %s176_s22 }
  0x11   : > { %s2253_s24 = scalar_select %p63_p5, %s2163_s14, %s65_s19  }
  0x12   : > { %s2673_s1 = sld [smem:[#allocation13_spill]]  ;;  %p2260_p6 = pnand %p1939_p4, %p74_p3 }
  0x13   : > { %s178_s4 = scalar_lea.vmem [#allocation5], %s1910_s25  ;;  %s2264_s6 = scalar_lea.sflag [#allocation6], %s174_s21 }
  0x14   : > { %s186_s5 = sshll.u32 %s178_s4, 4  ;;  %s2177_s7 = smov 2048   ;;  %s187_s5 = int_to_ptr.vmem [resolvable:$true] %s186_s5 }
  0x15   : > { %s2178_s8 = smov 256   ;;  %s2179_s9 = smov 16  }
  0x16   : > { %s2270_s10 = sadd.s32 4294967295, %s2175_s17   ;;  %s1368_s11 = sadd.s32 4294967294, %s2175_s17  }
  0x17   : > { %p78_p7 = scmp.ne.s32.totalorder %s2159_s13, %s2155_s12  ;;  %p79_p8 = scmp.eq.s32.totalorder %s2270_s10, 0 }
  0x18   : > { %s183_s28 = scalar_lea.hbm %s2673_s1, %s1803_s23  ;;  %p130_p9 = scmp.eq.s32.totalorder %s2270_s10, 7 }
  0x19   : > { %s184_s29 = sshll.u32 %s183_s28, 4  ;;  %p136_p10 = scmp.eq.s32.totalorder %s1368_s11, 7  ;;  %s185_s29 = int_to_ptr.hbm [resolvable:$true] %s184_s29 }
  0x1a   : > { %1930 = dma.hbm_to_vmem [thread:$0]  (!%p2260_p6), %s185_s29, 12288, %s187_s5, %s2264_s6, %s2177_s7, %s2178_s8, %s2179_s9  }
  0x1b   : > { %p2279_p11 = por %p79_p8, %p78_p7  ;;  %p1369_p12 = scmp.ge.s32.totalorder %s2175_s17, 1 }
  0x1c   : > { %p2287_p13 = por %p130_p9, %p72_p1  ;;  %p2291_p0 = por %p136_p10, %p78_p7 }
  0x1d   : > { %p143_p2 = scmp.lt.s32.totalorder %s2175_s17, 9  ;;  %s2678_s0 = sld [smem:[#allocation12_spill]] }
  0x1e   : > { %s2180_s28 = smov [#allocation2]   ;;  %s1374_s4 = sshll.u32 %s176_s22, 2 }
  0x1f   : > { %p2299_p3 = pnand %p1369_p12, %p143_p2  ;;  %s160_s29 = sshll.u32 %s2180_s28, 4  ;;  %s161_s29 = int_to_ptr.vmem [resolvable:$true] %s160_s29 }
  0x20   : > { %s1375_s5 = sshll.u32 %s2171_s16, 2  ;;  %s200_s7 = scalar_lea.vmem [#allocation7], %s1374_s4 }
  0x21   : > { %p1923_p1 = pneg %p2299_p3  ;;  %s208_s8 = sshll.u32 %s200_s7, 4  ;;  %s209_s8 = int_to_ptr.vmem [resolvable:$true] %s208_s8 }
  0x22   : > { %s204_s23 = scalar_lea.hbm %s2669_s2, %s1375_s5  ;;  %s2181_s25 = smov 192  }
  0x23   : > { %s158_s26 = sshll.u32 %s2678_s0, 4  ;;  %p1924_p4 = pnand %p1923_p1, %p79_p8  ;;  %s159_s26 = int_to_ptr.hbm [resolvable:$true] %s158_s26 }
  0x24   : > { %s2182_s0 = smov 12   ;;  %s206_s1 = sshll.u32 %s204_s23, 4  ;;  %s207_s1 = int_to_ptr.hbm [resolvable:$true] %s206_s1 }
  0x25   : > { %1926 = dma.hbm_to_vmem [thread:$0]  (!%p1924_p4), %s159_s26, 1152, %s161_s29, [#allocation3], %s2181_s25, %s2181_s25, %s2182_s0  }
  0x26   : > { %1933 = dma.hbm_to_vmem [thread:$0]  (!%p2260_p6), %s207_s1, 64, %s209_s8, %s2264_s6  }
  0x27   : > { %217 = sbr.rel (%p2299_p3) target bundleno = 363 (0x16b), region = 32 }
  0x2c   : > { %2142 = dma.done.wait (%p79_p8), [#allocation3], 1152  }
  0x2d   : > { %2144 = vsyncadd (%p79_p8), [#allocation3], 4294966144  ;;  %s224_s22 = sand.u32 1, %s2270_s10   ;;  %s2324_s28 = sand.u32 1, %s2159_s13  }
  0x2e   : > { %s1911_s0 = smul.u32 768, %s2324_s28  ;;  %s225_s26 = scalar_lea.sflag [#allocation6], %s224_s22 }
  0x30   : > { %s2327_s30 = scalar_lea.vmem [#allocation5], %s1911_s0 }
  0x31   : > { %2146 = dma.done.wait (%p2279_p11), %s225_s26, 12352  }
  0x32   : > { %2148 = vsyncadd (%p2279_p11), %s225_s26, 4294954944  ;;  %v1529_v0 = vld [vmem:[%s2327_s30 + $0xe0] sm:$0xf]  ;;  %v1843_v1 = vld [vmem:[%s2327_s30 + $0xec] sm:$0xf0]  ;;  %s1378_s1 = sshll.u32 %s2324_s28, 2 }
  0x33   : > { %v1657_v2 = vld [vmem:[%s2327_s30 + $0x1e0] sm:$0xf]  ;;  %v1530_v3 = vor.u32 %v1843_v1, %v1529_v0  ;;  %v1875_v4 = vld [vmem:[%s2327_s30 + $0x1ec] sm:$0xf0]  ;;  %v1841_v9 = vld [vmem:[%s2327_s30 + $0xe4] sm:$0xf] }
  0x34   : > { %v1785_v5 = vld [vmem:[%s2327_s30 + $0x2e0] sm:$0xf]  ;;  %v1907_v6 = vld [vmem:[%s2327_s30 + $0x2ec] sm:$0xf0]  ;;  %v1658_v7 = vor.u32 %v1875_v4, %v1657_v2  ;;  %v1531_v10 = vld [vmem:[%s2327_s30 + $0xf0] sm:$0xf0] }
  0x35   : > { %v1786_v8 = vor.u32 %v1907_v6, %v1785_v5  ;;  %v1513_v11 = vld [vmem:[%s2327_s30 + $0xc0] sm:$0xf]  ;;  %918 = vmatpush.bf16.msra.mxu0 %v1530_v3  ;;  %v1534_v12 = vor.u32 %v1841_v9, %v1531_v10  ;;  %v1839_v13 = vld [vmem:[%s2327_s30 + $0xcc] sm:$0xf0]  ;;  %v1837_v20 = vld [vmem:[%s2327_s30 + $0xc4] sm:$0xf] }
  0x36   : > { %v1641_v14 = vld [vmem:[%s2327_s30 + $0x1c0] sm:$0xf]  ;;  %v1871_v15 = vld [vmem:[%s2327_s30 + $0x1cc] sm:$0xf0]  ;;  %942 = vmatpush.bf16.msra.mxu1 %v1658_v7  ;;  %v1514_v16 = vor.u32 %v1839_v13, %v1513_v11  ;;  %v1515_v22 = vld [vmem:[%s2327_s30 + $0xd0] sm:$0xf0] }
  0x37   : > { %966 = vmatpush.bf16.msra.mxu2 %v1786_v8  ;;  %v1642_v17 = vor.u32 %v1871_v15, %v1641_v14  ;;  %v1769_v18 = vld [vmem:[%s2327_s30 + $0x2c0] sm:$0xf]  ;;  %v1903_v19 = vld [vmem:[%s2327_s30 + $0x2cc] sm:$0xf0]  ;;  %990 = vmatpush.bf16.msra.mxu3 %v1534_v12  ;;  %v1518_v25 = vor.u32 %v1837_v20, %v1515_v22  ;;  %v1833_v31 = vld [vmem:[%s2327_s30 + $0xa4] sm:$0xf] }
  0x38   : > { %v1770_v21 = vor.u32 %v1903_v19, %v1769_v18  ;;  %v1497_v23 = vld [vmem:[%s2327_s30 + $0xa0] sm:$0xf]  ;;  %v1835_v24 = vld [vmem:[%s2327_s30 + $0xac] sm:$0xf0]  ;;  %v1499_v32 = vld [vmem:[%s2327_s30 + $0xb0] sm:$0xf0] }
  0x39   : > { %v1625_v26 = vld [vmem:[%s2327_s30 + $0x1a0] sm:$0xf]  ;;  %v1867_v27 = vld [vmem:[%s2327_s30 + $0x1ac] sm:$0xf0]  ;;  %919 = vmatpush.bf16.msra.mxu0 %v1514_v16  ;;  %v1498_v29 = vor.u32 %v1835_v24, %v1497_v23  ;;  %v1502_v38 = vor.u32 %v1833_v31, %v1499_v32  ;;  %v1829_v42 = vld [vmem:[%s2327_s30 + $0x84] sm:$0xf] }
  0x3a   : > { %v1753_v28 = vld [vmem:[%s2327_s30 + $0x2a0] sm:$0xf]  ;;  %v1899_v30 = vld [vmem:[%s2327_s30 + $0x2ac] sm:$0xf0]  ;;  %943 = vmatpush.bf16.msra.mxu1 %v1642_v17  ;;  %v1626_v33 = vor.u32 %v1867_v27, %v1625_v26  ;;  %v1483_v43 = vld [vmem:[%s2327_s30 + $0x90] sm:$0xf0] }
  0x3b   : > { %967 = vmatpush.bf16.msra.mxu2 %v1770_v21  ;;  %v1754_v34 = vor.u32 %v1899_v30, %v1753_v28  ;;  %v1481_v35 = vld [vmem:[%s2327_s30 + $0x80] sm:$0xf]  ;;  %v1831_v36 = vld [vmem:[%s2327_s30 + $0x8c] sm:$0xf0]  ;;  %991 = vmatpush.bf16.msra.mxu3 %v1518_v25  ;;  %v1486_v50 = vor.u32 %v1829_v42, %v1483_v43  ;;  %v1825_v54 = vld [vmem:[%s2327_s30 + $0x64] sm:$0xf] }
  0x3c   : > { %v1609_v37 = vld [vmem:[%s2327_s30 + $0x180] sm:$0xf]  ;;  %v1863_v39 = vld [vmem:[%s2327_s30 + $0x18c] sm:$0xf0]  ;;  %v1482_v44 = vor.u32 %v1831_v36, %v1481_v35  ;;  %v1467_v55 = vld [vmem:[%s2327_s30 + $0x70] sm:$0xf0] }
  0x3d   : > { %v1737_v40 = vld [vmem:[%s2327_s30 + $0x280] sm:$0xf]  ;;  %v1895_v41 = vld [vmem:[%s2327_s30 + $0x28c] sm:$0xf0]  ;;  %920 = vmatpush.bf16.msra.mxu0 %v1498_v29  ;;  %v1610_v45 = vor.u32 %v1863_v39, %v1609_v37  ;;  %v1470_v62 = vor.u32 %v1825_v54, %v1467_v55  ;;  %v1821_v2 = vld [vmem:[%s2327_s30 + $0x44] sm:$0xf] }
  0x3e   : > { %944 = vmatpush.bf16.msra.mxu1 %v1626_v33  ;;  %v1738_v46 = vor.u32 %v1895_v41, %v1737_v40  ;;  %v1465_v47 = vld [vmem:[%s2327_s30 + $0x60] sm:$0xf]  ;;  %v1827_v48 = vld [vmem:[%s2327_s30 + $0x6c] sm:$0xf0]  ;;  %v1451_v3 = vld [vmem:[%s2327_s30 + $0x50] sm:$0xf0] }
  0x3f   : > { %968 = vmatpush.bf16.msra.mxu2 %v1754_v34  ;;  %v1593_v49 = vld [vmem:[%s2327_s30 + $0x160] sm:$0xf]  ;;  %992 = vmatpush.bf16.msra.mxu3 %v1502_v38  ;;  %v1859_v51 = vld [vmem:[%s2327_s30 + $0x16c] sm:$0xf0]  ;;  %v1466_v56 = vor.u32 %v1827_v48, %v1465_v47  ;;  %v1454_v10 = vor.u32 %v1821_v2, %v1451_v3  ;;  %v1817_v14 = vld [vmem:[%s2327_s30 + $0x24] sm:$0xf] }
  0x40   : > { %v1721_v52 = vld [vmem:[%s2327_s30 + $0x260] sm:$0xf]  ;;  %v1891_v53 = vld [vmem:[%s2327_s30 + $0x26c] sm:$0xf0]  ;;  %v1594_v57 = vor.u32 %v1859_v51, %v1593_v49  ;;  %v1435_v15 = vld [vmem:[%s2327_s30 + $0x30] sm:$0xf0] }
  0x41   : > { %921 = vmatpush.bf16.msra.mxu0 %v1482_v44  ;;  %v1722_v58 = vor.u32 %v1891_v53, %v1721_v52  ;;  %v1449_v59 = vld [vmem:[%s2327_s30 + $0x40] sm:$0xf]  ;;  %v1823_v60 = vld [vmem:[%s2327_s30 + $0x4c] sm:$0xf0]  ;;  %v1438_v25 = vor.u32 %v1817_v14, %v1435_v15  ;;  %v1813_v26 = vld [vmem:[%s2327_s30 + $0x4] sm:$0xf] }
  0x42   : > { %945 = vmatpush.bf16.msra.mxu1 %v1610_v45  ;;  %v1577_v61 = vld [vmem:[%s2327_s30 + $0x140] sm:$0xf]  ;;  %v1855_v63 = vld [vmem:[%s2327_s30 + $0x14c] sm:$0xf0]  ;;  %v1450_v4 = vor.u32 %v1823_v60, %v1449_v59  ;;  %v1419_v27 = vld [vmem:[%s2327_s30 + $0x10] sm:$0xf0] }
  0x43   : > { %969 = vmatpush.bf16.msra.mxu2 %v1738_v46  ;;  %993 = vmatpush.bf16.msra.mxu3 %v1486_v50  ;;  %v1705_v0 = vld [vmem:[%s2327_s30 + $0x240] sm:$0xf]  ;;  %v1887_v1 = vld [vmem:[%s2327_s30 + $0x24c] sm:$0xf0]  ;;  %v1578_v5 = vor.u32 %v1855_v63, %v1577_v61  ;;  %v1381_v28 = vld [vmem:[#allocation2] sm:$0xf]  ;;  %v1422_v41 = vor.u32 %v1813_v26, %v1419_v27 }
  0x44   : > { %v1706_v6 = vor.u32 %v1887_v1, %v1705_v0  ;;  %v1433_v7 = vld [vmem:[%s2327_s30 + $0x20] sm:$0xf]  ;;  %v1819_v8 = vld [vmem:[%s2327_s30 + $0x2c] sm:$0xf0]  ;;  %v1805_v29 = vld [vmem:[#allocation2 + $0x8] sm:$0xf0] }
  0x45   : > { %922 = vmatpush.bf16.msra.mxu0 %v1466_v56  ;;  %v1561_v9 = vld [vmem:[%s2327_s30 + $0x120] sm:$0xf]  ;;  %v1851_v11 = vld [vmem:[%s2327_s30 + $0x12c] sm:$0xf0]  ;;  %v1434_v16 = vor.u32 %v1819_v8, %v1433_v7  ;;  %v1537_v30 = vld [vmem:[%s2327_s30 + $0xe8] sm:$0xf]  ;;  %v2404_v46 = vor.u32 %v1805_v29, %v1381_v28 }
  0x46   : > { %946 = vmatpush.bf16.msra.mxu1 %v1594_v57  ;;  %v1689_v12 = vld [vmem:[%s2327_s30 + $0x220] sm:$0xf]  ;;  %v1883_v13 = vld [vmem:[%s2327_s30 + $0x22c] sm:$0xf0]  ;;  %v1562_v20 = vor.u32 %v1851_v11, %v1561_v9  ;;  %v1844_v31 = vld [vmem:[%s2327_s30 + $0xf4] sm:$0xf0] }
  0x47   : > { %970 = vmatpush.bf16.msra.mxu2 %v1722_v58  ;;  %994 = vmatpush.bf16.msra.mxu3 %v1470_v62  ;;  %v1417_v17 = vld [vmem:[%s2327_s30] sm:$0xf]  ;;  %v1815_v18 = vld [vmem:[%s2327_s30 + $0xc] sm:$0xf0]  ;;  %v1690_v21 = vor.u32 %v1883_v13, %v1689_v12  ;;  %v1804_v33 = vld [vmem:[#allocation2 + $0x4] sm:$0xf]  ;;  %v1538_v42 = vor.u32 %v1844_v31, %v1537_v30 }
  0x48   : > { %v1545_v19 = vld [vmem:[%s2327_s30 + $0x100] sm:$0xf]  ;;  %v1847_v22 = vld [vmem:[%s2327_s30 + $0x10c] sm:$0xf0]  ;;  %v1418_v32 = vor.u32 %v1815_v18, %v1417_v17  ;;  %v1665_v34 = vld [vmem:[%s2327_s30 + $0x1e8] sm:$0xf] }
  0x49   : > { %923 = vmatpush.bf16.msra.mxu0 %v1450_v4  ;;  %v1673_v23 = vld [vmem:[%s2327_s30 + $0x200] sm:$0xf]  ;;  %v1879_v24 = vld [vmem:[%s2327_s30 + $0x20c] sm:$0xf0]  ;;  %v1876_v35 = vld [vmem:[%s2327_s30 + $0x1f4] sm:$0xf0]  ;;  %v1546_v36 = vor.u32 %v1847_v22, %v1545_v19 }
  0x4a   : > { %947 = vmatpush.bf16.msra.mxu1 %v1578_v5  ;;  %v1674_v37 = vor.u32 %v1879_v24, %v1673_v23  ;;  %v1383_v38 = vld [vmem:[#allocation2 + $0xc] sm:$0xf0]  ;;  %v1389_v39 = vld [vmem:[#allocation2 + $0x8] sm:$0xf]  ;;  %v1806_v40 = vld [vmem:[#allocation2 + $0x10] sm:$0xf0]  ;;  %v1666_v47 = vor.u32 %v1876_v35, %v1665_v34 }
  0x4b   : > { %971 = vmatpush.bf16.msra.mxu2 %v1706_v6  ;;  %995 = vmatpush.bf16.msra.mxu3 %v1454_v10  ;;  %v1905_v43 = vld [vmem:[%s2327_s30 + $0x2e4] sm:$0xf]  ;;  %v1787_v44 = vld [vmem:[%s2327_s30 + $0x2f0] sm:$0xf0]  ;;  %v1521_v45 = vld [vmem:[%s2327_s30 + $0xc8] sm:$0xf]  ;;  %v2409_v51 = vor.u32 %v1804_v33, %v1383_v38  ;;  %v2411_v52 = vor.u32 %v1806_v40, %v1389_v39 }
  0x4c   : > { %v1840_v48 = vld [vmem:[%s2327_s30 + $0xd4] sm:$0xf0]  ;;  %v1873_v49 = vld [vmem:[%s2327_s30 + $0x1e4] sm:$0xf]  ;;  %v1659_v50 = vld [vmem:[%s2327_s30 + $0x1f0] sm:$0xf0]  ;;  %v1790_v55 = vor.u32 %v1905_v43, %v1787_v44 }
  0x4d   : > { %924 = vmatpush.bf16.msra.mxu0 %v1434_v16  ;;  %v1649_v53 = vld [vmem:[%s2327_s30 + $0x1c8] sm:$0xf]  ;;  %v1872_v54 = vld [vmem:[%s2327_s30 + $0x1d4] sm:$0xf0]  ;;  %v1522_v56 = vor.u32 %v1840_v48, %v1521_v45  ;;  %v1662_v57 = vor.u32 %v1873_v49, %v1659_v50  ;;  %v1901_v58 = vld [vmem:[%s2327_s30 + $0x2c4] sm:$0xf] }
  0x4e   : > { %948 = vmatpush.bf16.msra.mxu1 %v1562_v20  ;;  %v1771_v59 = vld [vmem:[%s2327_s30 + $0x2d0] sm:$0xf0]  ;;  %v1505_v60 = vld [vmem:[%s2327_s30 + $0xa8] sm:$0xf]  ;;  %v1650_v61 = vor.u32 %v1872_v54, %v1649_v53  ;;  %v1836_v62 = vld [vmem:[%s2327_s30 + $0xb4] sm:$0xf0] }
  0x4f   : > { %972 = vmatpush.bf16.msra.mxu2 %v1690_v21  ;;  %996 = vmatpush.bf16.msra.mxu3 %v1438_v25  ;;  %v1869_v63 = vld [vmem:[%s2327_s30 + $0x1c4] sm:$0xf]  ;;  %v1643_v0 = vld [vmem:[%s2327_s30 + $0x1d0] sm:$0xf0]  ;;  %v1633_v1 = vld [vmem:[%s2327_s30 + $0x1a8] sm:$0xf]  ;;  %v1774_v3 = vor.u32 %v1901_v58, %v1771_v59  ;;  %v1506_v4 = vor.u32 %v1836_v62, %v1505_v60 }
  0x50   : > { %v1868_v2 = vld [vmem:[%s2327_s30 + $0x1b4] sm:$0xf0]  ;;  %v1646_v5 = vor.u32 %v1869_v63, %v1643_v0  ;;  %v1897_v6 = vld [vmem:[%s2327_s30 + $0x2a4] sm:$0xf]  ;;  %v1755_v7 = vld [vmem:[%s2327_s30 + $0x2b0] sm:$0xf0] }
  0x51   : > { %925 = vmatpush.bf16.msra.mxu0 %v1418_v32  ;;  %v1489_v8 = vld [vmem:[%s2327_s30 + $0x88] sm:$0xf]  ;;  %v1634_v9 = vor.u32 %v1868_v2, %v1633_v1  ;;  %v1832_v10 = vld [vmem:[%s2327_s30 + $0x94] sm:$0xf0]  ;;  %v1865_v11 = vld [vmem:[%s2327_s30 + $0x1a4] sm:$0xf]  ;;  %v1758_v15 = vor.u32 %v1897_v6, %v1755_v7 }
  0x52   : > { %949 = vmatpush.bf16.msra.mxu1 %v1546_v36  ;;  %v1627_v12 = vld [vmem:[%s2327_s30 + $0x1b0] sm:$0xf0]  ;;  %v1617_v13 = vld [vmem:[%s2327_s30 + $0x188] sm:$0xf]  ;;  %v1864_v14 = vld [vmem:[%s2327_s30 + $0x194] sm:$0xf0]  ;;  %v1490_v18 = vor.u32 %v1832_v10, %v1489_v8 }
  0x53   : > { %973 = vmatpush.bf16.msra.mxu2 %v1674_v37  ;;  %997 = vmatpush.bf16.msra.mxu3 %v1422_v41  ;;  %v1393_v16 = vld [vmem:[#allocation2 + $0x18] sm:$0xf]  ;;  %v1808_v17 = vld [vmem:[#allocation2 + $0x20] sm:$0xf0]  ;;  %v1630_v19 = vor.u32 %v1865_v11, %v1627_v12  ;;  %v1893_v20 = vld [vmem:[%s2327_s30 + $0x284] sm:$0xf]  ;;  %v1618_v23 = vor.u32 %v1864_v14, %v1617_v13 }
  0x54   : > { %926 = vmatmul.bf16.vlgmr.msra.gmra.mxu0 %v2404_v46  ;;  %v1739_v21 = vld [vmem:[%s2327_s30 + $0x290] sm:$0xf0]  ;;  %v1473_v22 = vld [vmem:[%s2327_s30 + $0x68] sm:$0xf]  ;;  %v1828_v24 = vld [vmem:[%s2327_s30 + $0x74] sm:$0xf0]  ;;  %v2446_v39 = vor.u32 %v1808_v17, %v1393_v16 }
  0x55   : > { %950 = vmatmul.bf16.vlgmr.msra.gmra.mxu1 %v2409_v51  ;;  %1014 = vmatpush.bf16.msrb.mxu0 %v1662_v57  ;;  %v1861_v25 = vld [vmem:[%s2327_s30 + $0x184] sm:$0xf]  ;;  %v1611_v26 = vld [vmem:[%s2327_s30 + $0x190] sm:$0xf0]  ;;  %v1601_v28 = vld [vmem:[%s2327_s30 + $0x168] sm:$0xf]  ;;  %v1742_v33 = vor.u32 %v1893_v20, %v1739_v21  ;;  %v1474_v34 = vor.u32 %v1828_v24, %v1473_v22 }
  0x56   : > { %974 = vmatmul.bf16.vlgmr.msra.gmra.mxu2 %v2411_v52  ;;  %998 = vmatmul.bf16.vlgmr.msra.gmra.mxu3 %v2404_v46  ;;  %v1807_v27 = vld [vmem:[#allocation2 + $0x1c] sm:$0xf]  ;;  %v1860_v29 = vld [vmem:[%s2327_s30 + $0x174] sm:$0xf0]  ;;  %v1395_v30 = vld [vmem:[#allocation2 + $0x24] sm:$0xf0]  ;;  %v1614_v35 = vor.u32 %v1861_v25, %v1611_v26 }
  0x57   : > { %1062 = vmatpush.bf16.msrb.mxu2 %v1538_v42  ;;  %1086 = vmatpush.bf16.msrb.mxu3 %v1666_v47  ;;  %v1401_v31 = vld [vmem:[#allocation2 + $0x20] sm:$0xf]  ;;  %v1809_v32 = vld [vmem:[#allocation2 + $0x28] sm:$0xf0]  ;;  %v1723_v37 = vld [vmem:[%s2327_s30 + $0x270] sm:$0xf0]  ;;  %v1602_v40 = vor.u32 %v1860_v29, %v1601_v28  ;;  %v2451_v44 = vor.u32 %v1807_v27, %v1395_v30 }
  0x58   : > { %1038 = vmatpush.bf16.msrb.mxu1 %v1790_v55  ;;  %v1889_v36 = vld [vmem:[%s2327_s30 + $0x264] sm:$0xf]  ;;  %v1457_v38 = vld [vmem:[%s2327_s30 + $0x48] sm:$0xf]  ;;  %v1824_v41 = vld [vmem:[%s2327_s30 + $0x54] sm:$0xf0]  ;;  %v2453_v45 = vor.u32 %v1809_v32, %v1401_v31 }
  0x59   : > { %1015 = vmatpush.bf16.msrb.mxu0 %v1646_v5  ;;  %v1857_v42 = vld [vmem:[%s2327_s30 + $0x164] sm:$0xf]  ;;  %v1595_v43 = vld [vmem:[%s2327_s30 + $0x170] sm:$0xf0]  ;;  %v1585_v47 = vld [vmem:[%s2327_s30 + $0x148] sm:$0xf]  ;;  %v1726_v49 = vor.u32 %v1889_v36, %v1723_v37  ;;  %v1458_v50 = vor.u32 %v1824_v41, %v1457_v38 }
  0x5a   : > { %v1856_v48 = vld [vmem:[%s2327_s30 + $0x154] sm:$0xf0]  ;;  %v1598_v53 = vor.u32 %v1857_v42, %v1595_v43  ;;  %v1885_v54 = vld [vmem:[%s2327_s30 + $0x244] sm:$0xf]  ;;  %v1707_v55 = vld [vmem:[%s2327_s30 + $0x250] sm:$0xf0] }
  0x5b   : > { %1063 = vmatpush.bf16.msrb.mxu2 %v1522_v56  ;;  %1087 = vmatpush.bf16.msrb.mxu3 %v1650_v61  ;;  %v1441_v56 = vld [vmem:[%s2327_s30 + $0x28] sm:$0xf]  ;;  %v1586_v57 = vor.u32 %v1856_v48, %v1585_v47  ;;  %v1820_v58 = vld [vmem:[%s2327_s30 + $0x34] sm:$0xf0]  ;;  %v1853_v59 = vld [vmem:[%s2327_s30 + $0x144] sm:$0xf]  ;;  %v1710_v63 = vor.u32 %v1885_v54, %v1707_v55 }
  0x5c   : > { %1039 = vmatpush.bf16.msrb.mxu1 %v1774_v3  ;;  %v1579_v60 = vld [vmem:[%s2327_s30 + $0x150] sm:$0xf0]  ;;  %v1569_v61 = vld [vmem:[%s2327_s30 + $0x128] sm:$0xf]  ;;  %v1852_v62 = vld [vmem:[%s2327_s30 + $0x134] sm:$0xf0]  ;;  %v1442_v1 = vor.u32 %v1820_v58, %v1441_v56 }
  0x5d   : > { %1016 = vmatpush.bf16.msrb.mxu0 %v1630_v19  ;;  %v1881_v0 = vld [vmem:[%s2327_s30 + $0x224] sm:$0xf]  ;;  %v1582_v2 = vor.u32 %v1853_v59, %v1579_v60  ;;  %v1691_v3 = vld [vmem:[%s2327_s30 + $0x230] sm:$0xf0]  ;;  %v1570_v6 = vor.u32 %v1852_v62, %v1569_v61  ;;  %v1425_v7 = vld [vmem:[%s2327_s30 + $0x8] sm:$0xf] }
  0x5e   : > { %v1563_v5 = vld [vmem:[%s2327_s30 + $0x130] sm:$0xf0]  ;;  %v1816_v8 = vld [vmem:[%s2327_s30 + $0x14] sm:$0xf0]  ;;  %v1874_v11 = vld [vmem:[%s2327_s30 + $0x1ec] sm:$0xf]  ;;  %v1694_v13 = vor.u32 %v1881_v0, %v1691_v3 }
  0x5f   : > { %1064 = vmatpush.bf16.msrb.mxu2 %v1506_v4  ;;  %1088 = vmatpush.bf16.msrb.mxu3 %v1634_v9  ;;  %v1849_v4 = vld [vmem:[%s2327_s30 + $0x124] sm:$0xf]  ;;  %v1553_v9 = vld [vmem:[%s2327_s30 + $0x108] sm:$0xf]  ;;  %v1848_v10 = vld [vmem:[%s2327_s30 + $0x114] sm:$0xf0]  ;;  %v1426_v19 = vor.u32 %v1816_v8, %v1425_v7 }
  0x60   : > { %1040 = vmatpush.bf16.msrb.mxu1 %v1758_v15  ;;  %v1667_v12 = vld [vmem:[%s2327_s30 + $0x1f8] sm:$0xf0]  ;;  %v1906_v14 = vld [vmem:[%s2327_s30 + $0x2ec] sm:$0xf]  ;;  %v1405_v16 = vld [vmem:[#allocation2 + $0x30] sm:$0xf] }
  0x61   : > { %1017 = vmatpush.bf16.msrb.mxu0 %v1614_v35  ;;  %v1795_v15 = vld [vmem:[%s2327_s30 + $0x2f8] sm:$0xf0]  ;;  %v1811_v17 = vld [vmem:[#allocation2 + $0x38] sm:$0xf0]  ;;  %v1845_v20 = vld [vmem:[%s2327_s30 + $0x104] sm:$0xf]  ;;  %v1670_v25 = vor.u32 %v1874_v11, %v1667_v12 }
  0x62   : > { %v1877_v21 = vld [vmem:[%s2327_s30 + $0x204] sm:$0xf]  ;;  %v1675_v22 = vld [vmem:[%s2327_s30 + $0x210] sm:$0xf0]  ;;  %v1842_v26 = vld [vmem:[%s2327_s30 + $0xec] sm:$0xf]  ;;  %v1798_v29 = vor.u32 %v1906_v14, %v1795_v15  ;;  %v2492_v42 = vor.u32 %v1811_v17, %v1405_v16 }
  0x63   : > { %1065 = vmatpush.bf16.msrb.mxu2 %v1490_v18  ;;  %1089 = vmatpush.bf16.msrb.mxu3 %v1618_v23  ;;  %v1566_v18 = vor.u32 %v1849_v4, %v1563_v5  ;;  %v1554_v23 = vor.u32 %v1848_v10, %v1553_v9  ;;  %v1547_v24 = vld [vmem:[%s2327_s30 + $0x110] sm:$0xf0]  ;;  %v1539_v27 = vld [vmem:[%s2327_s30 + $0xf8] sm:$0xf0]  ;;  %v1810_v28 = vld [vmem:[#allocation2 + $0x34] sm:$0xf]  ;;  %v1678_v35 = vor.u32 %v1877_v21, %v1675_v22 }
  0x64   : > { %1041 = vmatpush.bf16.msrb.mxu1 %v1742_v33  ;;  %931 = vmatmul.bf16.gmra.mxu0 %v2446_v39  ;;  %v1870_v30 = vld [vmem:[%s2327_s30 + $0x1cc] sm:$0xf]  ;;  %v1651_v31 = vld [vmem:[%s2327_s30 + $0x1d8] sm:$0xf0]  ;;  %v1407_v32 = vld [vmem:[#allocation2 + $0x3c] sm:$0xf0]  ;;  %v1550_v36 = vor.u32 %v1845_v20, %v1547_v24  ;;  %v1542_v37 = vor.u32 %v1842_v26, %v1539_v27 }
  0x65   : > { %955 = vmatmul.bf16.gmra.mxu1 %v2451_v44  ;;  %1018 = vmatpush.bf16.msrb.mxu0 %v1598_v53  ;;  %v1413_v33 = vld [vmem:[#allocation2 + $0x38] sm:$0xf]  ;;  %v1793_v38 = vld [vmem:[%s2327_s30 + $0x2e8] sm:$0xf]  ;;  %v1902_v41 = vld [vmem:[%s2327_s30 + $0x2cc] sm:$0xf]  ;;  %v1654_v43 = vor.u32 %v1870_v30, %v1651_v31 }
  0x66   : > { %979 = vmatmul.bf16.gmra.mxu2 %v2453_v45  ;;  %1003 = vmatmul.bf16.gmra.mxu3 %v2446_v39  ;;  %v1779_v47 = vld [vmem:[%s2327_s30 + $0x2d8] sm:$0xf0]  ;;  %v1838_v48 = vld [vmem:[%s2327_s30 + $0xcc] sm:$0xf]  ;;  %v1777_v59 = vld [vmem:[%s2327_s30 + $0x2c8] sm:$0xf] }
  0x67   : > { %1066 = vmatpush.bf16.msrb.mxu2 %v1474_v34  ;;  %1090 = vmatpush.bf16.msrb.mxu3 %v1602_v40  ;;  %v1812_v34 = vld [vmem:[#allocation2 + $0x40] sm:$0xf0]  ;;  %v1908_v40 = vld [vmem:[%s2327_s30 + $0x2f4] sm:$0xf0]  ;;  %v1866_v54 = vld [vmem:[%s2327_s30 + $0x1ac] sm:$0xf] }
  0x68   : > { %1042 = vmatpush.bf16.msrb.mxu1 %v1726_v49  ;;  %v1523_v49 = vld [vmem:[%s2327_s30 + $0xd8] sm:$0xf0]  ;;  %v2499_v53 = vor.u32 %v1812_v34, %v1413_v33  ;;  %v1794_v56 = vor.u32 %v1908_v40, %v1793_v38  ;;  %v1904_v60 = vld [vmem:[%s2327_s30 + $0x2d4] sm:$0xf0]  ;;  %v1898_v62 = vld [vmem:[%s2327_s30 + $0x2ac] sm:$0xf] }
  0x69   : > { %1019 = vmatpush.bf16.msrb.mxu0 %v1582_v2  ;;  %v1635_v55 = vld [vmem:[%s2327_s30 + $0x1b8] sm:$0xf0]  ;;  %v1526_v58 = vor.u32 %v1838_v48, %v1523_v49  ;;  %v1778_v0 = vor.u32 %v1904_v60, %v1777_v59  ;;  %v1862_v3 = vld [vmem:[%s2327_s30 + $0x18c] sm:$0xf]  ;;  %v1761_v7 = vld [vmem:[%s2327_s30 + $0x2a8] sm:$0xf] }
  0x6a   : > { %v1638_v61 = vor.u32 %v1866_v54, %v1635_v55  ;;  %v1507_v2 = vld [vmem:[%s2327_s30 + $0xb8] sm:$0xf0]  ;;  %v1900_v8 = vld [vmem:[%s2327_s30 + $0x2b4] sm:$0xf0]  ;;  %v1894_v10 = vld [vmem:[%s2327_s30 + $0x28c] sm:$0xf] }
  0x6b   : > { %1067 = vmatpush.bf16.msrb.mxu2 %v1458_v50  ;;  %1091 = vmatpush.bf16.msrb.mxu3 %v1586_v57  ;;  %v2497_v50 = vor.u32 %v1810_v28, %v1407_v32  ;;  %v1782_v57 = vor.u32 %v1902_v41, %v1779_v47  ;;  %v1747_v11 = vld [vmem:[%s2327_s30 + $0x298] sm:$0xf0]  ;;  %v1830_v12 = vld [vmem:[%s2327_s30 + $0x8c] sm:$0xf]  ;;  %v1762_v16 = vor.u32 %v1900_v8, %v1761_v7  ;;  %v1896_v20 = vld [vmem:[%s2327_s30 + $0x294] sm:$0xf0] }
  0x6c   : > { %1043 = vmatpush.bf16.msrb.mxu1 %v1710_v63  ;;  %v1763_v63 = vld [vmem:[%s2327_s30 + $0x2b8] sm:$0xf0]  ;;  %v1858_v14 = vld [vmem:[%s2327_s30 + $0x16c] sm:$0xf]  ;;  %v1750_v17 = vor.u32 %v1894_v10, %v1747_v11  ;;  %v1729_v32 = vld [vmem:[%s2327_s30 + $0x268] sm:$0xf] }
  0x6d   : > { %1020 = vmatpush.bf16.msrb.mxu0 %v1566_v18  ;;  %v1766_v4 = vor.u32 %v1898_v62, %v1763_v63  ;;  %v1603_v15 = vld [vmem:[%s2327_s30 + $0x178] sm:$0xf0]  ;;  %v1890_v21 = vld [vmem:[%s2327_s30 + $0x26c] sm:$0xf]  ;;  %v1892_v33 = vld [vmem:[%s2327_s30 + $0x274] sm:$0xf0] }
  0x6e   : > { %v1606_v22 = vor.u32 %v1858_v14, %v1603_v15  ;;  %v1826_v24 = vld [vmem:[%s2327_s30 + $0x6c] sm:$0xf]  ;;  %v1587_v27 = vld [vmem:[%s2327_s30 + $0x158] sm:$0xf0]  ;;  %v1730_v34 = vor.u32 %v1892_v33, %v1729_v32  ;;  %v1713_v49 = vld [vmem:[%s2327_s30 + $0x248] sm:$0xf] }
  0x6f   : > { %1068 = vmatpush.bf16.msrb.mxu2 %v1442_v1  ;;  %1092 = vmatpush.bf16.msrb.mxu3 %v1570_v6  ;;  %v1834_v1 = vld [vmem:[%s2327_s30 + $0xac] sm:$0xf]  ;;  %v1619_v6 = vld [vmem:[%s2327_s30 + $0x198] sm:$0xf0]  ;;  %v1888_v54 = vld [vmem:[%s2327_s30 + $0x254] sm:$0xf0] }
  0x70   : > { %1044 = vmatpush.bf16.msrb.mxu1 %v1694_v13  ;;  %v1510_v5 = vor.u32 %v1834_v1, %v1507_v2  ;;  %v1622_v9 = vor.u32 %v1862_v3, %v1619_v6  ;;  %v1491_v13 = vld [vmem:[%s2327_s30 + $0x98] sm:$0xf0]  ;;  %v1854_v26 = vld [vmem:[%s2327_s30 + $0x14c] sm:$0xf]  ;;  %v1697_v62 = vld [vmem:[%s2327_s30 + $0x228] sm:$0xf] }
  0x71   : > { %1021 = vmatpush.bf16.msrb.mxu0 %v1550_v36  ;;  %v1494_v18 = vor.u32 %v1830_v12, %v1491_v13  ;;  %v1590_v31 = vor.u32 %v1854_v26, %v1587_v27  ;;  %v1715_v36 = vld [vmem:[%s2327_s30 + $0x258] sm:$0xf0]  ;;  %v1850_v41 = vld [vmem:[%s2327_s30 + $0x12c] sm:$0xf]  ;;  %v1884_v63 = vld [vmem:[%s2327_s30 + $0x234] sm:$0xf0] }
  0x72   : > { %v1459_v40 = vld [vmem:[%s2327_s30 + $0x58] sm:$0xf0]  ;;  %v1882_v55 = vld [vmem:[%s2327_s30 + $0x22c] sm:$0xf]  ;;  %v1698_v1 = vor.u32 %v1884_v63, %v1697_v62  ;;  %v1681_v6 = vld [vmem:[%s2327_s30 + $0x208] sm:$0xf] }
  0x73   : > { %1069 = vmatpush.bf16.msrb.mxu2 %v1426_v19  ;;  %1093 = vmatpush.bf16.msrb.mxu3 %v1554_v23  ;;  %v1745_v19 = vld [vmem:[%s2327_s30 + $0x288] sm:$0xf]  ;;  %v1731_v23 = vld [vmem:[%s2327_s30 + $0x278] sm:$0xf0]  ;;  %v1878_v3 = vld [vmem:[%s2327_s30 + $0x20c] sm:$0xf] }
  0x74   : > { %1045 = vmatpush.bf16.msrb.mxu1 %v1678_v35  ;;  %936 = vmatmul.bf16.gmra.mxu0 %v2492_v42  ;;  %v1746_v28 = vor.u32 %v1896_v20, %v1745_v19  ;;  %v1886_v35 = vld [vmem:[%s2327_s30 + $0x24c] sm:$0xf]  ;;  %v1443_v59 = vld [vmem:[%s2327_s30 + $0x38] sm:$0xf0]  ;;  %v1880_v7 = vld [vmem:[%s2327_s30 + $0x214] sm:$0xf0] }
  0x75   : > { %960 = vmatmul.bf16.gmra.mxu1 %v2497_v50  ;;  %1110 = vmatpush.bf16.msra.mxu0 %v1794_v56  ;;  %v1718_v38 = vor.u32 %v1886_v35, %v1715_v36  ;;  %v1714_v56 = vor.u32 %v1888_v54, %v1713_v49  ;;  %v1555_v2 = vld [vmem:[%s2327_s30 + $0x118] sm:$0xf0]  ;;  %v1814_v8 = vld [vmem:[%s2327_s30 + $0xc] sm:$0xf]  ;;  %v1682_v12 = vor.u32 %v1880_v7, %v1681_v6  ;;  %s238_s6 = scalar_lea.vmem [#allocation7], %s1378_s1  ;;  %s1912_s10 = smul.u32 192, %s2324_s28 }
  0x76   : > { %984 = vmatmul.bf16.gmra.mxu2 %v2499_v53  ;;  %1008 = vmatmul.bf16.gmra.mxu3 %v2492_v42  ;;  %v1427_v10 = vld [vmem:[%s2327_s30 + $0x18] sm:$0xf0]  ;;  %v2576_v13 = vld [vmem:[%s238_s6] sm:$0xf]  ;;  %s1909_s27 = sshll.u32 %s2167_s15, 5  ;;  %s1231_s15 = scalar_lea.sflag [#allocation4], %s2324_s28 }
  0x77   : > { %1158 = vmatpush.bf16.msra.mxu2 %v1670_v25  ;;  %1182 = vmatpush.bf16.msra.mxu3 %v1798_v29  ;;  %v1475_v25 = vld [vmem:[%s2327_s30 + $0x78] sm:$0xf0]  ;;  %v1734_v29 = vor.u32 %v1890_v21, %v1731_v23  ;;  %v1430_v11 = vor.u32 %v1814_v8, %v1427_v10  ;;  %v382_v14 = vperm.slane %v2576_v13, 0  ;;  %s2584_s19 = scalar_lea.vmem [#allocation8], %s1912_s10  ;;  %v383_v49 = vperm.slane %v2576_v13, 1  ;;  %s1245_s5 = scalar_lea.hbm %s2670_s3, %s1909_s27 }
  0x78   : > { %1134 = vmatpush.bf16.msra.mxu1 %v1542_v37  ;;  %v1478_v30 = vor.u32 %v1826_v24, %v1475_v25  ;;  %v1822_v37 = vld [vmem:[%s2327_s30 + $0x4c] sm:$0xf]  ;;  %s1246_s7 = sshll.u32 %s2584_s19, 4  ;;  %s1248_s8 = sshll.u32 %s1245_s5, 4  ;;  %s1247_s7 = int_to_ptr.vmem [resolvable:$true] %s1246_s7  ;;  %s1249_s8 = int_to_ptr.hbm [resolvable:$true] %s1248_s8 }
  0x79   : > { %1111 = vmatpush.bf16.msra.mxu0 %v1778_v0  ;;  %v1462_v47 = vor.u32 %v1822_v37, %v1459_v40  ;;  %v1846_v0 = vld [vmem:[%s2327_s30 + $0x10c] sm:$0xf]  ;;  %s2103_s9 = sshra.s32 %s1249_s8, 4  ;;  %s2109_s22 = scalar_lea.hbm %s2670_s3, 1536  ;;  %s2104_s9 = int_to_ptr.hbm [resolvable:$true] %s2103_s9 }
  0x7a   : > { %s2105_s11 = scalar_lea.hbm %s2104_s9, 192  ;;  %p2110_p8 = scmp.lt.s32.totalorder %s2104_s9, %s2670_s3 }
  0x7b   : > { %1159 = vmatpush.bf16.msra.mxu2 %v1654_v43  ;;  %1183 = vmatpush.bf16.msra.mxu3 %v1782_v57  ;;  %v1571_v43 = vld [vmem:[%s2327_s30 + $0x138] sm:$0xf0]  ;;  %p2106_p5 = scmp.ne.s32.totalorder %s2104_s9, %s2105_s11  ;;  %p2111_p9 = scmp.lt.s32.totalorder %s2109_s22, %s2105_s11 }
  0x7c   : > { %1135 = vmatpush.bf16.msra.mxu1 %v1526_v58  ;;  %v1574_v48 = vor.u32 %v1850_v41, %v1571_v43  ;;  %v1699_v57 = vld [vmem:[%s2327_s30 + $0x238] sm:$0xf0]  ;;  %v1818_v58 = vld [vmem:[%s2327_s30 + $0x2c] sm:$0xf] }
  0x7d   : > { %1112 = vmatpush.bf16.msra.mxu0 %v1762_v16  ;;  %v1702_v60 = vor.u32 %v1882_v55, %v1699_v57  ;;  %p2107_p6 = pnand %p2106_p5, %p2287_p13  ;;  %p2112_p10 = por %p2111_p9, %p2110_p8 }
  0x7f   : > { %1160 = vmatpush.bf16.msra.mxu2 %v1638_v61  ;;  %1184 = vmatpush.bf16.msra.mxu3 %v1766_v4  ;;  %v1446_v61 = vor.u32 %v1818_v58, %v1443_v59  ;;  %v1683_v4 = vld [vmem:[%s2327_s30 + $0x218] sm:$0xf0]  ;;  %p2108_p7 = pneg %p2107_p6 }
  0x80   : > { %1136 = vmatpush.bf16.msra.mxu1 %v1510_v5  ;;  %v1558_v5 = vor.u32 %v1846_v0, %v1555_v2 }
  0x81   : > { %1113 = vmatpush.bf16.msra.mxu0 %v1746_v28  ;;  %p2113_p11 = pnand %p2112_p10, %p2108_p7 }
  0x83   : > { %1161 = vmatpush.bf16.msra.mxu2 %v1622_v9  ;;  %1185 = vmatpush.bf16.msra.mxu3 %v1750_v17  ;;  %v1686_v9 = vor.u32 %v1878_v3, %v1683_v4 }
  0x84   : > { %1137 = vmatpush.bf16.msra.mxu1 %v1494_v18  ;;  %1022 = vmatmul.bf16.vlgmr.msrb.gmra.mxu0 %v2409_v51 }
  0x85   : > { %1046 = vmatmul.bf16.vlgmr.msrb.gmra.mxu1 %v2411_v52  ;;  %1114 = vmatpush.bf16.msra.mxu0 %v1730_v34 }
  0x86   : > { %1070 = vmatmul.bf16.vlgmr.msrb.gmra.mxu2 %v2404_v46  ;;  %1094 = vmatmul.bf16.vlgmr.msrb.gmra.mxu3 %v2409_v51 }
  0x87   : > { %1162 = vmatpush.bf16.msra.mxu2 %v1606_v22  ;;  %1186 = vmatpush.bf16.msra.mxu3 %v1734_v29 }
  0x88   : > { %1138 = vmatpush.bf16.msra.mxu1 %v1478_v30 }
  0x89   : > { %1115 = vmatpush.bf16.msra.mxu0 %v1714_v56 }
  0x8b   : > { %1163 = vmatpush.bf16.msra.mxu2 %v1590_v31  ;;  %1187 = vmatpush.bf16.msra.mxu3 %v1718_v38 }
  0x8c   : > { %1139 = vmatpush.bf16.msra.mxu1 %v1462_v47 }
  0x8d   : > { %1116 = vmatpush.bf16.msra.mxu0 %v1698_v1 }
  0x8f   : > { %1164 = vmatpush.bf16.msra.mxu2 %v1574_v48  ;;  %1188 = vmatpush.bf16.msra.mxu3 %v1702_v60 }
  0x90   : > { %1140 = vmatpush.bf16.msra.mxu1 %v1446_v61 }
  0x91   : > { %1117 = vmatpush.bf16.msra.mxu0 %v1682_v12 }
  0x93   : > { %1165 = vmatpush.bf16.msra.mxu2 %v1558_v5  ;;  %1189 = vmatpush.bf16.msra.mxu3 %v1686_v9 }
  0x94   : > { %1141 = vmatpush.bf16.msra.mxu1 %v1430_v11  ;;  %1027 = vmatmul.bf16.gmra.mxu0 %v2451_v44 }
  0x95   : > { %1051 = vmatmul.bf16.gmra.mxu1 %v2453_v45 }
  0x96   : > { %1075 = vmatmul.bf16.gmra.mxu2 %v2446_v39  ;;  %1099 = vmatmul.bf16.gmra.mxu3 %v2451_v44 }
  0xa4   : > { %1032 = vmatmul.bf16.gmra.mxu0 %v2497_v50 }
  0xa5   : > { %1056 = vmatmul.bf16.gmra.mxu1 %v2499_v53 }
  0xa6   : > { %1080 = vmatmul.bf16.gmra.mxu2 %v2492_v42  ;;  %1104 = vmatmul.bf16.gmra.mxu3 %v2497_v50 }
  0xb4   : > { %1118 = vmatmul.bf16.vlgmr.msra.gmra.mxu0 %v2411_v52 }
  0xb5   : > { %1142 = vmatmul.bf16.vlgmr.msra.gmra.mxu1 %v2404_v46 }
  0xb6   : > { %1166 = vmatmul.bf16.vlgmr.msra.gmra.mxu2 %v2409_v51  ;;  %1190 = vmatmul.bf16.vlgmr.msra.gmra.mxu3 %v2411_v52 }
  0xc4   : > { %1123 = vmatmul.bf16.gmra.mxu0 %v2453_v45 }
  0xc5   : > { %1147 = vmatmul.bf16.gmra.mxu1 %v2446_v39 }
  0xc6   : > { %1171 = vmatmul.bf16.gmra.mxu2 %v2451_v44  ;;  %1195 = vmatmul.bf16.gmra.mxu3 %v2453_v45 }
  0xd1   : > { %v927_v15 = vpop.f32.mrf.mxu0 }
  0xd2   : > { %v928_v46 = vadd.f32 %v927_v15, %v382_v14  ;;  %v951_v16 = vpop.f32.mrf.mxu1 }
  0xd4   : > { %1128 = vmatmul.bf16.gmra.mxu0 %v2499_v53  ;;  %v952_v51 = vadd.f32 %v951_v16, %v928_v46 }
  0xd5   : > { %1152 = vmatmul.bf16.gmra.mxu1 %v2492_v42 }
  0xd6   : > { %1176 = vmatmul.bf16.gmra.mxu2 %v2497_v50  ;;  %1200 = vmatmul.bf16.gmra.mxu3 %v2499_v53 }
  0xd9   : > { %v975_v52 = vpop.f32.mrf.mxu2  ;;  %v999_v44 = vpop.f32.mrf.mxu3 }
  0xda   : > { %v976_v39 = vadd.f32 %v975_v52, %v952_v51  ;;  %v929_v45 = vpop.f32.mrf.mxu0  ;;  %v953_v17 = vpop.f32.mrf.mxu1  ;;  %v1000_v55 = vadd.f32 %v999_v44, %v383_v49 }
  0xdb   : > { %v930_v18 = vadd.f32 %v929_v45, %v382_v14 }
  0xdc   : > { %1206 = vst [vmem:[%s2584_s19] sm:$0xff] %v976_v39 }
  0xdd   : > { %v954_v19 = vadd.f32 %v953_v17, %v930_v18 }
  0xe1   : > { %v977_v20 = vpop.f32.mrf.mxu2  ;;  %v1001_v42 = vpop.f32.mrf.mxu3 }
  0xe2   : > { %v978_v21 = vadd.f32 %v977_v20, %v954_v19  ;;  %v932_v22 = vpop.f32.mrf.mxu0  ;;  %v956_v23 = vpop.f32.mrf.mxu1  ;;  %v1002_v63 = vadd.f32 %v1001_v42, %v383_v49 }
  0xe3   : > { %v933_v50 = vadd.f32 %v932_v22, %v382_v14  ;;  %v2599_v22 = vperm.slane %v2576_v13, 2 }
  0xe4   : > { %1210 = vst [vmem:[%s2584_s19 + $0x20] sm:$0xff] %v978_v21 }
  0xe5   : > { %v957_v53 = vadd.f32 %v956_v23, %v933_v50 }
  0xe9   : > { %v980_v24 = vpop.f32.mrf.mxu2  ;;  %v1004_v26 = vpop.f32.mrf.mxu3 }
  0xea   : > { %v981_v25 = vadd.f32 %v980_v24, %v957_v53  ;;  %v934_v27 = vpop.f32.mrf.mxu0  ;;  %v958_v28 = vpop.f32.mrf.mxu1  ;;  %v1005_v6 = vadd.f32 %v1004_v26, %v383_v49 }
  0xeb   : > { %v935_v29 = vadd.f32 %v934_v27, %v382_v14 }
  0xec   : > { %1214 = vst [vmem:[%s2584_s19 + $0x40] sm:$0xff] %v981_v25 }
  0xed   : > { %v959_v30 = vadd.f32 %v958_v28, %v935_v29 }
  0xf1   : > { %v982_v31 = vpop.f32.mrf.mxu2  ;;  %v1006_v33 = vpop.f32.mrf.mxu3 }
  0xf2   : > { %v983_v32 = vadd.f32 %v982_v31, %v959_v30  ;;  %v937_v34 = vpop.f32.mrf.mxu0  ;;  %v961_v36 = vpop.f32.mrf.mxu1 }
  0xf3   : > { %v938_v35 = vadd.f32 %v937_v34, %v382_v14 }
  0xf4   : > { %1218 = vst [vmem:[%s2584_s19 + $0x60] sm:$0xff] %v983_v32  ;;  %v2604_v32 = vperm.slane %v2576_v13, 3 }
  0xf5   : > { %v962_v37 = vadd.f32 %v961_v36, %v938_v35 }
  0xf9   : > { %v985_v38 = vpop.f32.mrf.mxu2  ;;  %v1009_v41 = vpop.f32.mrf.mxu3 }
  0xfa   : > { %v986_v40 = vadd.f32 %v985_v38, %v962_v37  ;;  %v939_v43 = vpop.f32.mrf.mxu0  ;;  %v963_v47 = vpop.f32.mrf.mxu1  ;;  %v1010_v44 = vadd.f32 %v1009_v41, %v383_v49 }
  0xfb   : > { %v940_v48 = vadd.f32 %v939_v43, %v382_v14  ;;  %v1007_v14 = vadd.f32 %v1006_v33, %v383_v49 }
  0xfc   : > { %1222 = vst [vmem:[%s2584_s19 + $0x80] sm:$0xff] %v986_v40 }
  0xfd   : > { %v964_v54 = vadd.f32 %v963_v47, %v940_v48 }
 0x101   : > { %v987_v56 = vpop.f32.mrf.mxu2  ;;  %v1011_v58 = vpop.f32.mrf.mxu3 }
 0x102   : > { %v988_v57 = vadd.f32 %v987_v56, %v964_v54  ;;  %v1023_v59 = vpop.f32.mrf.mxu0  ;;  %v1047_v61 = vpop.f32.mrf.mxu1  ;;  %v1012_v42 = vadd.f32 %v1011_v58, %v383_v49 }
 0x103   : > { %v1024_v60 = vadd.f32 %v1023_v59, %v1000_v55 }
 0x104   : > { %1226 = vst [vmem:[%s2584_s19 + $0xa0] sm:$0xff] %v988_v57 }
 0x105   : > { %v1048_v62 = vadd.f32 %v1047_v61, %v1024_v60 }
 0x107   : > { %1207 = vst [vmem:[%s2584_s19 + $0x8] sm:$0xff] %v1048_v62 }
 0x109   : > { %v1071_v0 = vpop.f32.mrf.mxu2  ;;  %v1095_v1 = vpop.f32.mrf.mxu3 }
 0x10a   : > { %v1025_v2 = vpop.f32.mrf.mxu0  ;;  %v1049_v4 = vpop.f32.mrf.mxu1  ;;  %v1072_v26 = vadd.f32 %v1071_v0, %v2599_v22 }
 0x10b   : > { %v1026_v3 = vadd.f32 %v1025_v2, %v1002_v63 }
 0x10c   : > { %v1096_v28 = vadd.f32 %v1095_v1, %v1072_v26 }
 0x10d   : > { %v1050_v5 = vadd.f32 %v1049_v4, %v1026_v3 }
 0x10f   : > { %1211 = vst [vmem:[%s2584_s19 + $0x28] sm:$0xff] %v1050_v5 }
 0x111   : > { %v1073_v7 = vpop.f32.mrf.mxu2  ;;  %v1097_v8 = vpop.f32.mrf.mxu3 }
 0x112   : > { %v1028_v9 = vpop.f32.mrf.mxu0  ;;  %v1052_v11 = vpop.f32.mrf.mxu1  ;;  %v1074_v35 = vadd.f32 %v1073_v7, %v2599_v22 }
 0x113   : > { %v1029_v10 = vadd.f32 %v1028_v9, %v1005_v6 }
 0x114   : > { %v1098_v37 = vadd.f32 %v1097_v8, %v1074_v35 }
 0x115   : > { %v1053_v12 = vadd.f32 %v1052_v11, %v1029_v10 }
 0x117   : > { %1215 = vst [vmem:[%s2584_s19 + $0x48] sm:$0xff] %v1053_v12 }
 0x119   : > { %v1076_v15 = vpop.f32.mrf.mxu2  ;;  %v1100_v46 = vpop.f32.mrf.mxu3 }
 0x11a   : > { %v1030_v16 = vpop.f32.mrf.mxu0  ;;  %v1054_v52 = vpop.f32.mrf.mxu1  ;;  %v1077_v13 = vadd.f32 %v1076_v15, %v2599_v22 }
 0x11b   : > { %v1031_v51 = vadd.f32 %v1030_v16, %v1007_v14 }
 0x11c   : > { %v1101_v55 = vadd.f32 %v1100_v46, %v1077_v13 }
 0x11d   : > { %v1055_v39 = vadd.f32 %v1054_v52, %v1031_v51 }
 0x11f   : > { %1219 = vst [vmem:[%s2584_s19 + $0x68] sm:$0xff] %v1055_v39 }
 0x121   : > { %v1078_v45 = vpop.f32.mrf.mxu2  ;;  %v1102_v17 = vpop.f32.mrf.mxu3 }
 0x122   : > { %v1033_v18 = vpop.f32.mrf.mxu0  ;;  %v1057_v20 = vpop.f32.mrf.mxu1  ;;  %v1079_v63 = vadd.f32 %v1078_v45, %v2599_v22 }
 0x123   : > { %v1034_v19 = vadd.f32 %v1033_v18, %v1010_v44 }
 0x124   : > { %v1103_v1 = vadd.f32 %v1102_v17, %v1079_v63 }
 0x125   : > { %v1058_v21 = vadd.f32 %v1057_v20, %v1034_v19 }
 0x127   : > { %1223 = vst [vmem:[%s2584_s19 + $0x88] sm:$0xff] %v1058_v21 }
 0x129   : > { %v1081_v50 = vpop.f32.mrf.mxu2  ;;  %v1105_v23 = vpop.f32.mrf.mxu3 }
 0x12a   : > { %v1035_v53 = vpop.f32.mrf.mxu0  ;;  %v1059_v25 = vpop.f32.mrf.mxu1  ;;  %v1082_v9 = vadd.f32 %v1081_v50, %v2599_v22 }
 0x12b   : > { %v1036_v24 = vadd.f32 %v1035_v53, %v1012_v42 }
 0x12c   : > { %v1106_v11 = vadd.f32 %v1105_v23, %v1082_v9 }
 0x12d   : > { %v1060_v27 = vadd.f32 %v1059_v25, %v1036_v24 }
 0x12f   : > { %1227 = vst [vmem:[%s2584_s19 + $0xa8] sm:$0xff] %v1060_v27 }
 0x131   : > { %v1083_v29 = vpop.f32.mrf.mxu2  ;;  %v1107_v30 = vpop.f32.mrf.mxu3 }
 0x132   : > { %v1119_v31 = vpop.f32.mrf.mxu0  ;;  %v1143_v34 = vpop.f32.mrf.mxu1  ;;  %v1084_v39 = vadd.f32 %v1083_v29, %v2599_v22 }
 0x133   : > { %v1120_v33 = vadd.f32 %v1119_v31, %v1096_v28  ;;  %v1144_v36 = vadd.f32 %v1143_v34, %v2604_v32 }
 0x134   : > { %v1108_v45 = vadd.f32 %v1107_v30, %v1084_v39 }
 0x135   : > { %1208 = vst [vmem:[%s2584_s19 + $0x10] sm:$0xff] %v1120_v33 }
 0x139   : > { %v1167_v38 = vpop.f32.mrf.mxu2  ;;  %v1191_v41 = vpop.f32.mrf.mxu3 }
 0x13a   : > { %v1168_v40 = vadd.f32 %v1167_v38, %v1144_v36  ;;  %v1121_v43 = vpop.f32.mrf.mxu0  ;;  %v1145_v48 = vpop.f32.mrf.mxu1 }
 0x13b   : > { %v1122_v47 = vadd.f32 %v1121_v43, %v1098_v37  ;;  %v1146_v54 = vadd.f32 %v1145_v48, %v2604_v32 }
 0x13c   : > { %v1192_v49 = vadd.f32 %v1191_v41, %v1168_v40 }
 0x13d   : > { %1212 = vst [vmem:[%s2584_s19 + $0x30] sm:$0xff] %v1122_v47 }
 0x13e   : > { %1209 = vst [vmem:[%s2584_s19 + $0x18] sm:$0xff] %v1192_v49 }
 0x141   : > { %v1169_v56 = vpop.f32.mrf.mxu2  ;;  %v1193_v58 = vpop.f32.mrf.mxu3 }
 0x142   : > { %v1170_v57 = vadd.f32 %v1169_v56, %v1146_v54  ;;  %v1124_v59 = vpop.f32.mrf.mxu0  ;;  %v1148_v61 = vpop.f32.mrf.mxu1 }
 0x143   : > { %v1125_v60 = vadd.f32 %v1124_v59, %v1101_v55  ;;  %v1149_v0 = vadd.f32 %v1148_v61, %v2604_v32 }
 0x144   : > { %v1194_v62 = vadd.f32 %v1193_v58, %v1170_v57 }
 0x145   : > { %1216 = vst [vmem:[%s2584_s19 + $0x50] sm:$0xff] %v1125_v60 }
 0x146   : > { %1213 = vst [vmem:[%s2584_s19 + $0x38] sm:$0xff] %v1194_v62 }
 0x149   : > { %v1172_v2 = vpop.f32.mrf.mxu2  ;;  %v1196_v4 = vpop.f32.mrf.mxu3 }
 0x14a   : > { %v1173_v3 = vadd.f32 %v1172_v2, %v1149_v0  ;;  %v1126_v5 = vpop.f32.mrf.mxu0  ;;  %v1150_v7 = vpop.f32.mrf.mxu1 }
 0x14b   : > { %v1127_v6 = vadd.f32 %v1126_v5, %v1103_v1  ;;  %v1151_v10 = vadd.f32 %v1150_v7, %v2604_v32 }
 0x14c   : > { %v1197_v8 = vadd.f32 %v1196_v4, %v1173_v3 }
 0x14d   : > { %1220 = vst [vmem:[%s2584_s19 + $0x70] sm:$0xff] %v1127_v6 }
 0x14e   : > { %1217 = vst [vmem:[%s2584_s19 + $0x58] sm:$0xff] %v1197_v8 }
 0x151   : > { %v1174_v12 = vpop.f32.mrf.mxu2  ;;  %v1198_v15 = vpop.f32.mrf.mxu3 }
 0x152   : > { %v1175_v14 = vadd.f32 %v1174_v12, %v1151_v10  ;;  %v1129_v46 = vpop.f32.mrf.mxu0  ;;  %v1153_v51 = vpop.f32.mrf.mxu1 }
 0x153   : > { %v1130_v16 = vadd.f32 %v1129_v46, %v1106_v11  ;;  %v1154_v44 = vadd.f32 %v1153_v51, %v2604_v32 }
 0x154   : > { %v1199_v52 = vadd.f32 %v1198_v15, %v1175_v14 }
 0x155   : > { %1224 = vst [vmem:[%s2584_s19 + $0x90] sm:$0xff] %v1130_v16 }
 0x156   : > { %1221 = vst [vmem:[%s2584_s19 + $0x78] sm:$0xff] %v1199_v52 }
 0x159   : > { %v1177_v17 = vpop.f32.mrf.mxu2  ;;  %v1201_v19 = vpop.f32.mrf.mxu3 }
 0x15a   : > { %v1178_v18 = vadd.f32 %v1177_v17, %v1154_v44  ;;  %v1131_v20 = vpop.f32.mrf.mxu0  ;;  %v1155_v50 = vpop.f32.mrf.mxu1 }
 0x15b   : > { %v1132_v21 = vadd.f32 %v1131_v20, %v1108_v45  ;;  %v1156_v22 = vadd.f32 %v1155_v50, %v2604_v32 }
 0x15c   : > { %v1202_v42 = vadd.f32 %v1201_v19, %v1178_v18 }
 0x15d   : > { %1228 = vst [vmem:[%s2584_s19 + $0xb0] sm:$0xff] %v1132_v21 }
 0x15e   : > { %1225 = vst [vmem:[%s2584_s19 + $0x98] sm:$0xff] %v1202_v42 }
 0x161   : > { %v1179_v23 = vpop.f32.mrf.mxu2  ;;  %v1203_v24 = vpop.f32.mrf.mxu3 }
 0x162   : > { %v1180_v53 = vadd.f32 %v1179_v23, %v1156_v22 }
 0x164   : > { %v1204_v25 = vadd.f32 %v1203_v24, %v1180_v53 }
 0x166   : > { %1229 = vst [vmem:[%s2584_s19 + $0xb8] sm:$0xff] %v1204_v25 }
 0x167   : > { %2116 = shalt.err (!%p2113_p11)
}
 0x168   : > { %s2183_s28 = smov 512   ;;  %s2184_s30 = smov 4096  }
 0x169   : > { %s2185_s1 = smov 32  }
 0x16a   : > { %1921 = dma.vmem_to_hbm [thread:$0]  (%p2287_p13), %s1247_s7, 3072, %s1249_s8, %s1231_s15, %s2183_s28, %s2184_s30, %s2185_s1  }
 0x16b PF: > { %p1941_p12 = scmp.ge.s32.totalorder %s2175_s17, 2  ;;  %s1263_s6 = sand.u32 1, %s2155_s12  }
 0x16c   : > { %s1264_s10 = scalar_lea.sflag [#allocation4], %s1263_s6 }
 0x16d   : > { %p1935_p2 = pnand %p1941_p12, %p2291_p0 }
 0x16f   : > { %p1936_p3 = pneg %p1935_p2 }
 0x171   : > { %2150 = dma.done.wait (%p1936_p3), %s1264_s10, 3072  }
 0x172   : > { %2152 = vsyncadd (%p1936_p3), %s1264_s10, 4294964224  ;;  %s20_s17 = sadd.s32 1, %s2175_s17   ;;  %s2680_s12 = smov %s2159_s13 }
 0x173   : > { %p17_p1 = scmp.ge.s32.totalorder %s20_s17, 10   ;;  %s2681_s13 = smov %s2163_s14 }
 0x174   : > { %s2682_s14 = smov %s2253_s24  ;;  %s2683_s15 = smov %s2171_s16 }
 0x175   : > { %s2684_s16 = smov %s2686_s18  ;;  %19 = sbr.rel (!%p17_p1) target bundleno = 10 (0xa), region = 94 }
 0x17a   :  { %1270 = vsyncpa [#allocation3], 1 }
 0x17b   :  { %1272 = vsyncpa [#allocation3 + $0x1], 1 }
 0x17c   :  { %1273 = vsyncpa [#allocation6], 1 }
 0x17d   :  { %1275 = vsyncpa [#allocation6 + $0x1], 1 }
 0x17e   :  { %1276 = vsyncpa [#allocation4], 1 }
 0x17f   :  { %1278 = vsyncpa [#allocation4 + $0x1], 1 }

</bundles_post_ra>
